<compile_context>
chip_gen: v7x
topology: tpu7x:2x2x1
jax: 0.10.0
libtpu: 0.0.40
codegen_flags: <defaults>
</compile_context>

<pallas_src>
import jax
import jax.numpy as jnp
from jax.experimental import pallas as pl
from jax.experimental.pallas import tpu as pltpu

IN_DIM, H1, H2, OUT_DIM = 256, 128, 32, 1


def _cdiv(a, b):
    return -(-a // b)


def _round_up(n, m):
    return ((n + m - 1) // m) * m


def accent_regressor_kernel(x_ref, w1_ref, b1_ref, w2_ref, b2_ref,
                            w3_ref, b3_ref, o_ref):
    # x arrives straight from HBM (f32 by default); cast to bf16 on the VPU
    # (huge slack in this HBM-bound regime) right before the MXU feed.
    x = x_ref[...].astype(jnp.bfloat16)

    # Layer 1: (bt, 256) @ (256, 128) on the MXU, bf16 operands, f32 acc.
    h1 = jnp.dot(x, w1_ref[...], preferred_element_type=jnp.float32)
    h1 = jnp.maximum(h1 + b1_ref[...], 0.0)
    # dropout -> identity (eval-mode forward)

    # Layer 2: (bt, 128) @ (128, 32) on the MXU, bf16 operands, f32 acc.
    h2 = jnp.dot(h1.astype(jnp.bfloat16), w2_ref[...],
                 preferred_element_type=jnp.float32)
    h2 = jnp.maximum(h2 + b2_ref[...], 0.0)
    # dropout -> identity (eval-mode forward)

    # Layer 3 (32 -> 1): skip the MXU.  Transpose to (32, bt) (XLU) and do a
    # weighted sublane reduce (VPU) so the result is lane-dense over batch.
    h2_t = h2.T                                               # (32, bt) f32
    o = jnp.sum(h2_t * w3_ref[...], axis=0, keepdims=True)    # (1, bt)
    o = jnp.maximum(o + b3_ref[...], 0.0)
    o_ref[...] = o.reshape(o_ref.shape).astype(o_ref.dtype)


def prepare_params(params):
    """One-time dtype/shape prep (hoisted out of the per-call path)."""
    return dict(
        w1=params["w1"].astype(jnp.bfloat16),
        b1=params["b1"].reshape(1, H1).astype(jnp.float32),
        w2=params["w2"].astype(jnp.bfloat16),
        b2=params["b2"].reshape(1, H2).astype(jnp.float32),
        w3=params["w3"].reshape(H2, OUT_DIM).astype(jnp.float32),
        b3=params["b3"].reshape(1, OUT_DIM).astype(jnp.float32),
    )


def _choose_tiling(B, batch_tile):
    """Lane-aligned tile; <=~128 padded rows per tile; >=2 tiles when B>=256
    so v7x's two TensorCores both get work via the parallel grid axis."""
    B128 = _round_up(max(B, 1), 128)
    n_tiles = max(_cdiv(B128, batch_tile), 2 if B128 >= 256 else 1)
    bt = _round_up(_cdiv(B128, n_tiles), 128)
    n_tiles = _cdiv(B128, bt)
    return bt, n_tiles


def accent_regressor(x, params, *, batch_tile=4096, out_dtype=jnp.float32):
    """x: [B, 256]; params: raw or prepare_params()'d (weights in [in, out])."""
    B, D = x.shape
    assert D == IN_DIM and B >= 1

    bt, n_tiles = _choose_tiling(B, batch_tile)
    B_pad = n_tiles * bt        # virtual only: Pallas masks the ragged tail

    p = params
    if p["w1"].dtype != jnp.bfloat16:       # accept raw params too
        p = prepare_params(p)

    # Weights/biases: constant index_map -> resident in VMEM, never re-DMA'd.
    rep = lambda shape: pl.BlockSpec(shape, lambda i: (0, 0))

    # Deeper x pipeline only when the grid is long enough to exploit it
    # (mostly a v7x win; neutral on v5e/v6e).
    x_kwargs = {}
    if n_tiles >= 3:
        x_kwargs["pipeline_mode"] = pl.Buffered(3)
    x_spec = pl.BlockSpec((bt, IN_DIM), lambda i: (i, 0), **x_kwargs)

    x_itemsize = jnp.dtype(x.dtype).itemsize
    weight_bytes = ((IN_DIM * H1 + H1 * H2) * 2
                    + (H1 + H2 + H2 * OUT_DIM + OUT_DIM) * 4)
    cost = pl.CostEstimate(
        flops=2 * B_pad * (IN_DIM * H1 + H1 * H2 + H2 * OUT_DIM),
        transcendentals=0,
        bytes_accessed=B * IN_DIM * x_itemsize + B_pad * 4 + weight_bytes,
    )

    # Explicit VMEM budget: x-tile buffers + layer intermediates + slack.
    n_x_bufs = 3 if n_tiles >= 3 else 2
    vmem_limit = min(
        n_x_bufs * bt * IN_DIM * x_itemsize     # pipelined x tiles
        + 8 * bt * H1 * 4                       # h1/h2/transpose intermediates
        + (8 << 20),                            # resident weights, output, misc
        64 << 20,
    )

    out = pl.pallas_call(
        accent_regressor_kernel,
        out_shape=jax.ShapeDtypeStruct((n_tiles, 1, bt), out_dtype),
        grid_spec=pltpu.PrefetchScalarGridSpec(
            num_scalar_prefetch=0,
            grid=(n_tiles,),
            in_specs=[
                x_spec,
                rep((IN_DIM, H1)), rep((1, H1)),
                rep((H1, H2)),     rep((1, H2)),
                rep((H2, OUT_DIM)), rep((1, OUT_DIM)),
            ],
            # Lane-dense output: batch on the lane axis, one row per tile.
            out_specs=pl.BlockSpec((1, 1, bt), lambda i: (i, 0, 0)),
        ),
        compiler_params=pltpu.CompilerParams(
            dimension_semantics=("parallel",),
            vmem_limit_bytes=int(vmem_limit),
        ),
        cost_estimate=cost,
    )(x, p["w1"], p["b1"], p["w2"], p["b2"], p["w3"], p["b3"])

    # Padded rows carry garbage (relu-of-bias chains / masked reads) and are
    # sliced off here; never reduce over the raw kernel output.
    return out.reshape(B_pad, 1)[:B].astype(out_dtype)


def init_params(key):
    """Deterministic init mimicking nn.Linear's U(-1/sqrt(fan_in), +1/sqrt(fan_in))."""
    ks = jax.random.split(key, 6)

    def linear(kw, kb, fan_in, fan_out):
        bound = 1.0 / jnp.sqrt(fan_in)
        w = jax.random.uniform(kw, (fan_in, fan_out), jnp.float32, -bound, bound)
        b = jax.random.uniform(kb, (1, fan_out), jnp.float32, -bound, bound)
        return w, b

    w1, b1 = linear(ks[0], ks[1], IN_DIM, H1)
    w2, b2 = linear(ks[2], ks[3], H1, H2)
    w3, b3 = linear(ks[4], ks[5], H2, OUT_DIM)
    return dict(w1=w1, b1=b1, w2=w2, b2=b2, w3=w3, b3=b3)


def reference(x, p):
    """Pure-JAX reference with the same bf16 matmul operands / f32 accumulation."""
    xb = x.astype(jnp.bfloat16)
    h = jnp.dot(xb, p["w1"].astype(jnp.bfloat16),
                preferred_element_type=jnp.float32) + p["b1"]
    h = jnp.maximum(h, 0.0)
    h = jnp.dot(h.astype(jnp.bfloat16), p["w2"].astype(jnp.bfloat16),
                preferred_element_type=jnp.float32) + p["b2"]
    h = jnp.maximum(h, 0.0)
    return jnp.maximum(h @ p["w3"] + p["b3"], 0.0)


if __name__ == "__main__":
    key = jax.random.PRNGKey(0)
    k_x, k_p = jax.random.split(key)
    B = 200                                  # small demo batch; exercises the
    x = jax.random.normal(k_x, (B, IN_DIM), dtype=jnp.float32)  # 2-tile ragged path
    params = init_params(k_p)
    prepped = prepare_params(params)         # one-time dtype prep (hoisted)

    out = jax.block_until_ready(accent_regressor(x, prepped))
    ref = reference(x, params)

    assert out.shape == (B, OUT_DIM)
    assert jnp.allclose(out, ref, atol=1e-2, rtol=1e-2), (
        f"max abs err = {jnp.max(jnp.abs(out - ref))}")
    print("KERNEL_OK")
</pallas_src>

<mosaic_0001>
module attributes {stable_mosaic.version = 11 : i64} {
  func.func @accent_regressor_kernel(%arg0: i32, %arg1: memref<128x256xf32, #tpu.memory_space<vmem>>, %arg2: memref<256x128xbf16, #tpu.memory_space<vmem>>, %arg3: memref<1x128xf32, #tpu.memory_space<vmem>>, %arg4: memref<128x32xbf16, #tpu.memory_space<vmem>>, %arg5: memref<1x32xf32, #tpu.memory_space<vmem>>, %arg6: memref<32x1xf32, #tpu.memory_space<vmem>>, %arg7: memref<1x1xf32, #tpu.memory_space<vmem>>, %arg8: memref<1x1x128xf32, #tpu.memory_space<vmem>>) attributes {dimension_semantics = [#tpu.dimension_semantics<parallel>], iteration_bounds = array<i64: 2>, scalar_prefetch = 0 : i64, scratch_operands = 0 : i64, tpu.core_type = #tpu.core_type<tc>, window_params = [{transform_indices = @transform_0, window_bounds = array<i64: 128, 256>}, {pipeline_mode = #tpu.pipeline_mode<synchronous>, transform_indices = @transform_1, window_bounds = array<i64: 256, 128>}, {pipeline_mode = #tpu.pipeline_mode<synchronous>, transform_indices = @transform_2, window_bounds = array<i64: 1, 128>}, {pipeline_mode = #tpu.pipeline_mode<synchronous>, transform_indices = @transform_3, window_bounds = array<i64: 128, 32>}, {pipeline_mode = #tpu.pipeline_mode<synchronous>, transform_indices = @transform_4, window_bounds = array<i64: 1, 32>}, {pipeline_mode = #tpu.pipeline_mode<synchronous>, transform_indices = @transform_5, window_bounds = array<i64: 32, 1>}, {pipeline_mode = #tpu.pipeline_mode<synchronous>, transform_indices = @transform_6, window_bounds = array<i64: 1, 1>}, {transform_indices = @transform_7, window_bounds = array<i64: 1, 1, 128>}]} {
    %c0 = arith.constant 0 : index
    %c0_0 = arith.constant 0 : index
    %0 = vector.load %arg1[%c0, %c0_0] : memref<128x256xf32, #tpu.memory_space<vmem>>, vector<128x256xf32>
    %1 = arith.truncf %0 : vector<128x256xf32> to vector<128x256xbf16>
    %c0_1 = arith.constant 0 : index
    %c0_2 = arith.constant 0 : index
    %2 = vector.load %arg2[%c0_1, %c0_2] : memref<256x128xbf16, #tpu.memory_space<vmem>>, vector<256x128xbf16>
    %cst = arith.constant dense<0.000000e+00> : vector<128x128xf32>
    %3 = tpu.matmul %1, %2, %cst {dimension_numbers = #tpu.dot_dimension_numbers<[1], [0], [0], [1], [0, 0, 1, 1], [], []>} : vector<128x256xbf16>, vector<256x128xbf16>, vector<128x128xf32> -> vector<128x128xf32>
    %c0_3 = arith.constant 0 : index
    %c0_4 = arith.constant 0 : index
    %4 = vector.load %arg3[%c0_3, %c0_4] : memref<1x128xf32, #tpu.memory_space<vmem>>, vector<1x128xf32>
    %5 = vector.broadcast %4 : vector<1x128xf32> to vector<128x128xf32>
    %6 = arith.addf %3, %5 : vector<128x128xf32>
    %cst_5 = arith.constant 0.000000e+00 : f32
    %7 = vector.broadcast %cst_5 : f32 to vector<128x128xf32>
    %8 = arith.maximumf %6, %7 : vector<128x128xf32>
    %9 = arith.truncf %8 : vector<128x128xf32> to vector<128x128xbf16>
    %c0_6 = arith.constant 0 : index
    %c0_7 = arith.constant 0 : index
    %10 = vector.load %arg4[%c0_6, %c0_7] : memref<128x32xbf16, #tpu.memory_space<vmem>>, vector<128x32xbf16>
    %cst_8 = arith.constant dense<0.000000e+00> : vector<128x32xf32>
    %11 = tpu.matmul %9, %10, %cst_8 {dimension_numbers = #tpu.dot_dimension_numbers<[1], [0], [0], [1], [0, 0, 1, 1], [], []>} : vector<128x128xbf16>, vector<128x32xbf16>, vector<128x32xf32> -> vector<128x32xf32>
    %c0_9 = arith.constant 0 : index
    %c0_10 = arith.constant 0 : index
    %12 = vector.load %arg5[%c0_9, %c0_10] : memref<1x32xf32, #tpu.memory_space<vmem>>, vector<1x32xf32>
    %13 = vector.broadcast %12 : vector<1x32xf32> to vector<128x32xf32>
    %14 = arith.addf %11, %13 : vector<128x32xf32>
    %cst_11 = arith.constant 0.000000e+00 : f32
    %15 = vector.broadcast %cst_11 : f32 to vector<128x32xf32>
    %16 = arith.maximumf %14, %15 : vector<128x32xf32>
    %17 = tpu.transpose %16, [1, 0] : vector<128x32xf32> -> vector<32x128xf32>
    %c0_12 = arith.constant 0 : index
    %c0_13 = arith.constant 0 : index
    %18 = vector.load %arg6[%c0_12, %c0_13] : memref<32x1xf32, #tpu.memory_space<vmem>>, vector<32x1xf32>
    %19 = vector.broadcast %18 : vector<32x1xf32> to vector<32x128xf32>
    %20 = arith.mulf %17, %19 : vector<32x128xf32>
    %cst_14 = arith.constant dense<0.000000e+00> : vector<128xf32>
    %21 = vector.multi_reduction <add>, %20, %cst_14 [0] : vector<32x128xf32> to vector<128xf32>
    %22 = vector.shape_cast %21 : vector<128xf32> to vector<1x128xf32>
    %c0_15 = arith.constant 0 : index
    %c0_16 = arith.constant 0 : index
    %23 = vector.load %arg7[%c0_15, %c0_16] : memref<1x1xf32, #tpu.memory_space<vmem>>, vector<1x1xf32>
    %24 = vector.broadcast %23 : vector<1x1xf32> to vector<1x128xf32>
    %25 = arith.addf %22, %24 : vector<1x128xf32>
    %cst_17 = arith.constant 0.000000e+00 : f32
    %26 = vector.broadcast %cst_17 : f32 to vector<1x128xf32>
    %27 = arith.maximumf %25, %26 : vector<1x128xf32>
    %28 = vector.shape_cast %27 : vector<1x128xf32> to vector<1x1x128xf32>
    %c0_18 = arith.constant 0 : index
    %c0_19 = arith.constant 0 : index
    %c0_20 = arith.constant 0 : index
    %29 = vector.load %arg8[%c0_18, %c0_19, %c0_20] : memref<1x1x128xf32, #tpu.memory_space<vmem>>, vector<1x1x128xf32>
    tpu.vector_store %arg8[%c0_18, %c0_19, %c0_20], %28 {strides = array<i32>} : memref<1x1x128xf32, #tpu.memory_space<vmem>>, vector<1x1x128xf32>,
    return
  }
  func.func @transform_0(%arg0: i32) -> (i32, i32) {
    %c0_i32 = arith.constant 0 : i32
    %c0_i32_0 = arith.constant 0 : i32
    return %arg0, %c0_i32 : i32, i32
  }
  func.func @transform_1(%arg0: i32) -> (i32, i32) {
    %c0_i32 = arith.constant 0 : i32
    %c0_i32_0 = arith.constant 0 : i32
    %c0_i32_1 = arith.constant 0 : i32
    return %c0_i32, %c0_i32_0 : i32, i32
  }
  func.func @transform_2(%arg0: i32) -> (i32, i32) {
    %c0_i32 = arith.constant 0 : i32
    %c0_i32_0 = arith.constant 0 : i32
    %c0_i32_1 = arith.constant 0 : i32
    return %c0_i32, %c0_i32_0 : i32, i32
  }
  func.func @transform_3(%arg0: i32) -> (i32, i32) {
    %c0_i32 = arith.constant 0 : i32
    %c0_i32_0 = arith.constant 0 : i32
    %c0_i32_1 = arith.constant 0 : i32
    return %c0_i32, %c0_i32_0 : i32, i32
  }
  func.func @transform_4(%arg0: i32) -> (i32, i32) {
    %c0_i32 = arith.constant 0 : i32
    %c0_i32_0 = arith.constant 0 : i32
    %c0_i32_1 = arith.constant 0 : i32
    return %c0_i32, %c0_i32_0 : i32, i32
  }
  func.func @transform_5(%arg0: i32) -> (i32, i32) {
    %c0_i32 = arith.constant 0 : i32
    %c0_i32_0 = arith.constant 0 : i32
    %c0_i32_1 = arith.constant 0 : i32
    return %c0_i32, %c0_i32_0 : i32, i32
  }
  func.func @transform_6(%arg0: i32) -> (i32, i32) {
    %c0_i32 = arith.constant 0 : i32
    %c0_i32_0 = arith.constant 0 : i32
    %c0_i32_1 = arith.constant 0 : i32
    return %c0_i32, %c0_i32_0 : i32, i32
  }
  func.func @transform_7(%arg0: i32) -> (i32, i32, i32) {
    %c0_i32 = arith.constant 0 : i32
    %c0_i32_0 = arith.constant 0 : i32
    %c0_i32_1 = arith.constant 0 : i32
    return %arg0, %c0_i32, %c0_i32_0 : i32, i32, i32
  }
}

</mosaic_0001>

<bundles_post_ra>
// kernel: tpu_custom_call.1
= control target key start
LH: loop header
LB: loop body
LE: loop exit
PB: predicated region body
PF: predicated region fallthrough
CT: control target
= control target key end

     0   :  { %s1701_s0 = inlined_call_operand.hbm [shape: f32[200,256], index: 0, kind: input, shape index: {}]   ;;  %s1702_s1 = inlined_call_operand.hbm [shape: bf16[256,128], index: 1, kind: input, shape index: {}]   ;;  %s1703_s2 = inlined_call_operand.vmem [shape: f32[1,128], index: 2, kind: input, shape index: {}]   ;;  %s1704_s3 = inlined_call_operand.vmem [shape: bf16[128,32], index: 3, kind: input, shape index: {}]   ;;  %s1705_s4 = inlined_call_operand.vmem [shape: f32[1,32], index: 4, kind: input, shape index: {}]   ;;  %s1706_s5 = inlined_call_operand.vmem [shape: f32[32,1], index: 5, kind: input, shape index: {}]   ;;  %s1707_s6 = inlined_call_operand.<no memory space> [shape: f32[1,1], index: 6, kind: input, shape index: {}]   ;;  %s1708_s7 = inlined_call_operand.hbm [shape: f32[2,1,128], index: 7, kind: output, shape index: {}]  }
   0x1   :  { %v12_v0 = vstv %s1707_s6 }
   0x2   :  { %13 = vst [vmem:[#allocation2] sm:$0x1] %v12_v0 }
   0x3   :  { %14 = vsyncpa [#allocation4], 0 }
   0x4   :  { %16 = vsyncpa [#allocation4 + $0x1], 0 }
   0x5   :  { %17 = vsyncpa [#allocation7], 0 }
   0x6   :  { %18 = vsyncpa [#allocation5], 0 }
   0x7   :  { %20 = vsyncpa [#allocation5 + $0x1], 0  ;;  %s1408_s26 = smov 0   ;;  %s1410_s27 = smov 0  }
   0x8   :  { %s1412_s28 = smov 0   ;;  %s1414_s29 = smov 0  }
   0x9 LB: > { %s1429_s6 = sadd.s32 4294967295, %s1355_s29   ;;  %s987_s30 = sadd.s32 4294967294, %s1355_s29   ;;  %s1355_s29 = sphi %s1414_s29, %s1729_s29   ;;  %s1351_s28 = sphi %s1412_s28, %s1728_s28   ;;  %s1347_s27 = sphi %s1410_s27, %s1727_s27   ;;  %s1343_s26 = sphi %s1408_s26, %s1726_s26  }
   0xa   : > { %s1433_s8 = sadd.s32 1, %s1355_s29   ;;  %s33_s9 = sadd.s32 1, %s1351_s28 }
   0xb   : > { %s30_s10 = ssub.s32 %s1355_s29, %s1433_s8  ;;  %p40_p0 = scmp.ne.s32.totalorder %s1351_s28, %s1347_s27 }
   0xc   : > { %p31_p1 = scmp.eq.s32.totalorder %s30_s10, 0  ;;  %p41_p2 = scmp.eq.s32.totalorder %s1355_s29, 0 }
   0xd   : > { %p46_p3 = scmp.ne.s32.totalorder %s1347_s27, %s1343_s26  ;;  %p1709_p4 = scmp.eq.s32.totalorder %s1429_s6, 0 }
   0xe   : > { %s1445_s11 = scalar_select %p31_p1, %s1351_s28, %s33_s9  }
   0xf   : > { %p1447_p5 = por %p41_p2, %p40_p0  ;;  %p1453_p6 = por %p1709_p4, %p46_p3 }
  0x10   : > { %p196_p7 = scmp.eq.s32.totalorder %s1429_s6, 1  ;;  %p202_p8 = scmp.eq.s32.totalorder %s987_s30, 1 }
  0x11   : > { %s1713_s12 = scalar_select %p1447_p5, 1, 0 }
  0x12   : > { %s1714_s13 = scalar_select %p1453_p6, 1, 0 }
  0x13   : > { %p988_p9 = scmp.ge.s32.totalorder %s1355_s29, 1  ;;  %p209_p10 = scmp.lt.s32.totalorder %s1355_s29, 3 }
  0x14   : > { %p1460_p11 = por %p196_p7, %p40_p0  ;;  %p1464_p12 = por %p202_p8, %p46_p3 }
  0x15   : > { %p1468_p13 = pnand %p988_p9, %p209_p10  ;;  %s1357_s17 = smov [#allocation6]  }
  0x16   : > { %s1715_s14 = scalar_select %p1460_p11, 1, 0 }
  0x17   : > { %s1716_s15 = scalar_select %p1464_p12, 1, 0 }
  0x18   : > { %s1717_s16 = scalar_select %p1468_p13, 1, 0 }
  0x19   : > { %p1154_p1 = pneg %p1468_p13  ;;  %s221_s18 = sshll.u32 %s1357_s17, 4  ;;  %s222_s18 = int_to_ptr.vmem [resolvable:$true] %s221_s18 }
  0x1a   : > { %s1229_s22 = scalar_lea.hbm %s1702_s1, 2048 }
  0x1b   : > { %p1476_p2 = pnand %p1154_p1, %p1709_p4  ;;  %p1230_p0 = scmp.ne.s32.totalorder %s1702_s1, %s1229_s22 }
  0x1c   : > { %p1236_p9 = scmp.lt.u32.totalorder %s1229_s22, %s1702_s1 }
  0x1d   : > { %p1231_p3 = pneg %p1476_p2 }
  0x1f   : > { %p1232_p7 = pnand %p1231_p3, %p1230_p0 }
  0x21   : > { %p1233_p8 = pneg %p1232_p7 }
  0x23   : > { %p1238_p10 = pnand %p1236_p9, %p1233_p8 }
  0x25   : > { %1241 = shalt.err (!%p1238_p10)
}
  0x26   : > { %s1242_s9 = scalar_lea.vmem %s222_s18, 2048  ;;  %p1250_p11 = scmp.lt.s32.totalorder %s222_s18, %s222_s18 }
  0x27   : > { %p1243_p1 = scmp.ne.s32.totalorder %s222_s18, %s1242_s9  ;;  %p1251_p6 = scmp.lt.s32.totalorder %s1242_s9, %s1242_s9 }
  0x29   : > { %p1245_p4 = pnand %p1243_p1, %p1231_p3  ;;  %p1252_p13 = por %p1251_p6, %p1250_p11 }
  0x2b   : > { %p1246_p12 = pneg %p1245_p4 }
  0x2d   : > { %p1253_p5 = pnand %p1252_p13, %p1246_p12 }
  0x2f   : > { %1256 = shalt.err (!%p1253_p5)
}
  0x30   : > { %s1358_s10 = smov 64   ;;  %s1359_s17 = smov 4  }
  0x31   : > { %1157 = dma.hbm_to_vmem [thread:$0]  (!%p1476_p2), %s1702_s1, 2048, %s222_s18, [#allocation7], %s1358_s10, %s1358_s10, %s1359_s17  }
  0x32   : > { %p990_p0 = scmp.ge.s32.totalorder %s1355_s29, 2 }
  0x33   : > { %p1719_p4 = scmp.ne.s32.totalorder (!%p990_p0), %s1713_s12, 0 }
  0x34   : > { %246 = sbr.rel (%p990_p0) target bundleno = 94 (0x5e), region = 40 }
  0x3b   : > { %249 = sbr.rel (!%p1719_p4) target bundleno = 94 (0x5e), region = 44  ;;  %s250_s22 = sand.u32 (%p1719_p4), 1, %s1351_s28  }
  0x3c   : > { %s992_s23 = sshll.u32 (%p1719_p4), %s1355_s29, 4  ;;  %s991_s24 = sshll.u32 (%p1719_p4), %s250_s22, 8 }
  0x3d   : > { %s256_s25 = ssub.s32 (%p1719_p4), 25, %s992_s23  ;;  %s1506_s30 = scalar_lea.sflag (%p1719_p4), [#allocation4], %s250_s22 }
  0x3e   : > { %p257_p5 = scmp.lt.s32.totalorder (%p1719_p4), %s256_s25, 16  ;;  %s254_s9 = scalar_lea.vmem (%p1719_p4), [#allocation3], %s991_s24 }
  0x42   : > { %s1731_s25 = smov (!%p257_p5, %s256_s25), 16 }
  0x43   : > { %s1503_s19 = sshll.u32 %s1731_s25, 8 }
  0x44   : > { %s262_s18 = ssub.s32 4096, %s1503_s19 }
  0x45   : > { %263 = vsyncadd %s1506_s30, %s262_s18  ;;  %p995_p6 = scmp.ne.s32.totalorder %s1503_s19, 0  ;;  %s1034_s12 = sshll.u32 %s1355_s29, 12 }
  0x46   : > { %s1514_s20 = scalar_lea.hbm %s1701_s0, %s1034_s12  ;;  %s269_s21 = sshll.u32 %s254_s9, 4  ;;  %s1516_s21 = int_to_ptr.vmem [resolvable:$true] %s269_s21 }
  0x47   : > { %s1257_s22 = scalar_lea.hbm %s1514_s20, %s1503_s19  ;;  %s1261_s25 = scalar_lea.hbm %s1701_s0, 6400 }
  0x48   : > { %p1258_p11 = scmp.ne.s32.totalorder %s1514_s20, %s1257_s22  ;;  %p1262_p2 = scmp.lt.u32.totalorder %s1514_s20, %s1701_s0 }
  0x49   : > { %p1263_p3 = scmp.lt.u32.totalorder %s1261_s25, %s1257_s22  ;;  %p1265_p8 = scmp.lt.u32.totalorder %s1257_s22, %s1514_s20 }
  0x4a   : > { %p1259_p12 = pnand %p1258_p11, %p995_p6 }
  0x4b   : > { %p1264_p7 = por %p1263_p3, %p1262_p2 }
  0x4c   : > { %p1260_p13 = pneg %p1259_p12 }
  0x4d   : > { %p1266_p9 = por %p1265_p8, %p1264_p7 }
  0x4f   : > { %p1267_p10 = pnand %p1266_p9, %p1260_p13 }
  0x51   : > { %1270 = shalt.err (!%p1267_p10)
}
  0x52   : > { %s1271_s9 = scalar_lea.vmem %s1516_s21, %s1503_s19  ;;  %s1360_s12 = smov [#allocation3]  }
  0x53   : > { %p1272_p1 = scmp.ne.s32.totalorder %s1516_s21, %s1271_s9  ;;  %s1275_s17 = sshll.u32 %s1360_s12, 4  ;;  %s1276_s17 = int_to_ptr.vmem [resolvable:$false] %s1275_s17 }
  0x54   : > { %s1277_s23 = scalar_lea.vmem %s1276_s17, 8192  ;;  %p1278_p11 = scmp.lt.s32.totalorder %s1516_s21, %s1276_s17 }
  0x55   : > { %p1273_p4 = pnand %p1272_p1, %p995_p6  ;;  %p1279_p12 = scmp.lt.s32.totalorder %s1277_s23, %s1271_s9 }
  0x57   : > { %p1274_p5 = pneg %p1273_p4  ;;  %p1280_p2 = por %p1279_p12, %p1278_p11 }
  0x59   : > { %p1281_p3 = pnand %p1280_p2, %p1274_p5 }
  0x5b   : > { %1284 = shalt.err (!%p1281_p3)
}
  0x5c   : > { %s1361_s22 = smov 256   ;;  %s1362_s24 = smov 16  }
  0x5d   : > { %275 = dma.hbm_to_vmem [thread:$0]  (%p995_p6), %s1514_s20, %s1503_s19, %s1516_s21, %s1506_s30, %s1361_s22, %s1361_s22, %s1362_s24  }
  0x5e PF: > { %p1720_p13 = scmp.ne.s32.totalorder %s1717_s16, 0 }
  0x5f   : > { %s1546_s25 = sand.u32 (!%p1720_p13), 1, %s1347_s27   ;;  %p1721_p7 = scmp.ne.s32.totalorder (!%p1720_p13), %s1714_s13, 0 }
  0x60   : > { %281 = sbr.rel (%p1720_p13) target bundleno = 763 (0x2fb), region = 48  ;;  %s1001_s18 = sshll.u32 (!%p1720_p13), %s1546_s25, 8 }
  0x61   : > { %s284_s10 = scalar_lea.sflag (!%p1720_p13), [#allocation4], %s1546_s25  ;;  %s1550_s9 = scalar_lea.vmem (!%p1720_p13), [#allocation3], %s1001_s18 }
  0x67   : > { %1330 = dma.done.wait (%p1721_p7), %s284_s10, 4096  }
  0x68   : > { %1332 = vsyncadd (%p1721_p7), %s284_s10, 4294963200  ;;  %p1722_p6 = scmp.eq.s32.totalorder %s1429_s6, 0 }
  0x6a   : > { %1334 = dma.done.wait (%p1722_p6), [#allocation7], 2048   ;;  %p1723_p8 = pmov %p1722_p6 }
  0x6b   : > { %v1205_v1 = vld [vmem:[#allocation6 + $0x40] sm:$0xff]   ;;  %v1207_v3 = vld [vmem:[#allocation6 + $0x48] sm:$0xff]   ;;  %v1209_v5 = vld [vmem:[#allocation6 + $0x50] sm:$0xff]   ;;  %s1029_s13 = sshll.u32 %s1429_s6, 4  ;;  %s320_s16 = scalar_lea.vmem [#allocation8], %s1546_s25 }
  0x6c   : > { %1336 = vsyncadd (%p1723_p8), [#allocation7], 4294965248  ;;  %v1206_v2 = vld [vmem:[#allocation6] sm:$0xff]   ;;  %1035 = vmatprep.subr.bf16.mxu0 %v1205_v1  ;;  %v1208_v4 = vld [vmem:[#allocation6 + $0x8] sm:$0xff]   ;;  %s911_s19 = sshll.u32 %s320_s16, 4  ;;  %s1657_s21 = scalar_lea.hbm %s1708_s7, %s1029_s13  ;;  %s1659_s19 = int_to_ptr.vmem [resolvable:$true] %s911_s19 }
  0x6d   : > { %1036 = vmatpush3.bf16.msra.mxu0 %v1206_v2  ;;  %v1210_v6 = vld [vmem:[#allocation6 + $0x10] sm:$0xff]   ;;  %v1211_v7 = vld [vmem:[#allocation6 + $0x58] sm:$0xff]   ;;  %v1213_v9 = vld [vmem:[#allocation6 + $0x60] sm:$0xff]   ;;  %s899_s12 = scalar_lea.sflag [#allocation5], %s1546_s25  ;;  %s1285_s17 = scalar_lea.vmem %s1659_s19, 16 }
  0x6e   : > { %1037 = vmatprep.subr.bf16.mxu0 %v1207_v3  ;;  %v1212_v8 = vld [vmem:[#allocation6 + $0x18] sm:$0xff]   ;;  %v1214_v10 = vld [vmem:[#allocation6 + $0x20] sm:$0xff]   ;;  %v1215_v11 = vld [vmem:[#allocation6 + $0x68] sm:$0xff]   ;;  %p1286_p9 = scmp.ne.s32.totalorder %s1659_s19, %s1285_s17  ;;  %p1724_p10 = scmp.ne.s32.totalorder %s1715_s14, 0 }
  0x6f   : > { %v329_v12 = vld [vmem:[%s1550_s9 + $0x8] sm:$0xff]  ;;  %v331_v13 = vld [vmem:[%s1550_s9 + $0x18] sm:$0xff]  ;;  %v1217_v16 = vld [vmem:[#allocation6 + $0x70] sm:$0xff]   ;;  %s1364_s6 = smov [#allocation8]  }
  0x70   : > { %v361_v14 = vpack.c.bf16 %v331_v13, %v329_v12  ;;  %v1216_v15 = vld [vmem:[#allocation6 + $0x28] sm:$0xff]   ;;  %v1218_v17 = vld [vmem:[#allocation6 + $0x30] sm:$0xff]   ;;  %v1219_v18 = vld [vmem:[#allocation6 + $0x78] sm:$0xff]   ;;  %p1287_p1 = pnand %p1286_p9, %p1724_p10  ;;  %s1289_s23 = sshll.u32 %s1364_s6, 4  ;;  %s1290_s23 = int_to_ptr.vmem [resolvable:$false] %s1289_s23 }
  0x71   : > { %1038 = vmatpush3.bf16.msra.mxu0 %v1208_v4  ;;  %v1220_v19 = vld [vmem:[#allocation6 + $0x38] sm:$0xff]   ;;  %v328_v20 = vld [vmem:[%s1550_s9] sm:$0xff]  ;;  %v330_v21 = vld [vmem:[%s1550_s9 + $0x10] sm:$0xff]  ;;  %s1291_s22 = scalar_lea.vmem %s1290_s23, 32  ;;  %p1292_p5 = scmp.lt.s32.totalorder %s1659_s19, %s1290_s23 }
  0x72   : > { %1039 = vmatprep.subr.bf16.mxu0 %v1209_v5  ;;  %543 = vmatprep.mubr.bf16.mxu0 %v361_v14  ;;  %v333_v22 = vld [vmem:[%s1550_s9 + $0x28] sm:$0xff]  ;;  %v335_v23 = vld [vmem:[%s1550_s9 + $0x38] sm:$0xff]  ;;  %v360_v27 = vpack.c.bf16 %v330_v21, %v328_v20  ;;  %v332_v29 = vld [vmem:[%s1550_s9 + $0x20] sm:$0xff]  ;;  %p1288_p4 = pneg %p1287_p1  ;;  %p1293_p11 = scmp.lt.s32.totalorder %s1291_s22, %s1285_s17 }
  0x73   : > { %v1221_v24 = vld [vmem:[%s1704_s3] sm:$0xff]   ;;  %v1222_v25 = vld [vmem:[%s1704_s3 + $0x8] sm:$0xff]   ;;  %v1223_v26 = vld [vmem:[%s1704_s3 + $0x10] sm:$0xff]   ;;  %v363_v28 = vpack.c.bf16 %v335_v23, %v333_v22 }
  0x74   : > { %1115 = vmatprep.subr.bf16.mxu1 %v1221_v24  ;;  %v334_v30 = vld [vmem:[%s1550_s9 + $0x30] sm:$0xff]  ;;  %v337_v31 = vld [vmem:[%s1550_s9 + $0x48] sm:$0xff]  ;;  %v339_v32 = vld [vmem:[%s1550_s9 + $0x58] sm:$0xff]  ;;  %p1294_p12 = por %p1293_p11, %p1292_p5 }
  0x75   : > { %1040 = vmatpush3.bf16.msra.mxu0 %v1210_v6  ;;  %1116 = vmatpush3.bf16.msra.mxu1 %v1221_v24  ;;  %v362_v33 = vpack.c.bf16 %v334_v30, %v332_v29  ;;  %v365_v34 = vpack.c.bf16 %v339_v32, %v337_v31  ;;  %v336_v35 = vld [vmem:[%s1550_s9 + $0x40] sm:$0xff]  ;;  %v338_v36 = vld [vmem:[%s1550_s9 + $0x50] sm:$0xff]  ;;  %v341_v37 = vld [vmem:[%s1550_s9 + $0x68] sm:$0xff] }
  0x76   : > { %1041 = vmatprep.subr.bf16.mxu0 %v1211_v7  ;;  %1117 = vmatprep.subr.bf16.mxu1 %v1222_v25  ;;  %v343_v38 = vld [vmem:[%s1550_s9 + $0x78] sm:$0xff]  ;;  %v364_v39 = vpack.c.bf16 %v338_v36, %v336_v35  ;;  %v340_v41 = vld [vmem:[%s1550_s9 + $0x60] sm:$0xff]  ;;  %v342_v42 = vld [vmem:[%s1550_s9 + $0x70] sm:$0xff]  ;;  %p1295_p2 = pnand %p1294_p12, %p1288_p4 }
  0x77   : > { %v367_v40 = vpack.c.bf16 %v343_v38, %v341_v37  ;;  %v345_v43 = vld [vmem:[%s1550_s9 + $0x88] sm:$0xff]  ;;  %v347_v44 = vld [vmem:[%s1550_s9 + $0x98] sm:$0xff]  ;;  %v366_v45 = vpack.c.bf16 %v342_v42, %v340_v41  ;;  %v344_v47 = vld [vmem:[%s1550_s9 + $0x80] sm:$0xff] }
  0x78   : > { %v369_v46 = vpack.c.bf16 %v347_v44, %v345_v43  ;;  %v346_v48 = vld [vmem:[%s1550_s9 + $0x90] sm:$0xff]  ;;  %v349_v49 = vld [vmem:[%s1550_s9 + $0xa8] sm:$0xff]  ;;  %v351_v50 = vld [vmem:[%s1550_s9 + $0xb8] sm:$0xff] }
  0x79   : > { %1042 = vmatpush3.bf16.msra.mxu0 %v1212_v8  ;;  %1118 = vmatpush3.bf16.msra.mxu1 %v1222_v25  ;;  %v368_v51 = vpack.c.bf16 %v346_v48, %v344_v47  ;;  %v371_v52 = vpack.c.bf16 %v351_v50, %v349_v49  ;;  %v348_v53 = vld [vmem:[%s1550_s9 + $0xa0] sm:$0xff]  ;;  %v350_v54 = vld [vmem:[%s1550_s9 + $0xb0] sm:$0xff]  ;;  %v353_v55 = vld [vmem:[%s1550_s9 + $0xc8] sm:$0xff] }
  0x7a   : > { %1043 = vmatprep.subr.bf16.mxu0 %v1213_v9  ;;  %1119 = vmatprep.subr.bf16.mxu1 %v1223_v26  ;;  %v355_v56 = vld [vmem:[%s1550_s9 + $0xd8] sm:$0xff]  ;;  %v370_v57 = vpack.c.bf16 %v350_v54, %v348_v53  ;;  %v352_v59 = vld [vmem:[%s1550_s9 + $0xc0] sm:$0xff]  ;;  %v354_v60 = vld [vmem:[%s1550_s9 + $0xd0] sm:$0xff] }
  0x7b   : > { %v373_v58 = vpack.c.bf16 %v355_v56, %v353_v55  ;;  %v357_v61 = vld [vmem:[%s1550_s9 + $0xe8] sm:$0xff]  ;;  %v359_v62 = vld [vmem:[%s1550_s9 + $0xf8] sm:$0xff]  ;;  %v372_v63 = vpack.c.bf16 %v354_v60, %v352_v59  ;;  %v356_v1 = vld [vmem:[%s1550_s9 + $0xe0] sm:$0xff] }
  0x7c   : > { %v375_v0 = vpack.c.bf16 %v359_v62, %v357_v61  ;;  %v358_v2 = vld [vmem:[%s1550_s9 + $0xf0] sm:$0xff]  ;;  %v1225_v5 = vld [vmem:[%s1704_s3 + $0x20] sm:$0xff]   ;;  %v1226_v6 = vld [vmem:[%s1704_s3 + $0x28] sm:$0xff]  }
  0x7d   : > { %1044 = vmatpush3.bf16.msra.mxu0 %v1214_v10  ;;  %1120 = vmatpush3.bf16.msra.mxu1 %v1223_v26  ;;  %v374_v3 = vpack.c.bf16 %v358_v2, %v356_v1  ;;  %v1224_v4 = vld [vmem:[%s1704_s3 + $0x18] sm:$0xff]   ;;  %v1227_v7 = vld [vmem:[%s1704_s3 + $0x30] sm:$0xff]   ;;  %v1363_v10 = vmov 0   ;;  %v1625_v14 = vld [vmem:[%s1703_s2] ss:$0 sm:$0xff] }
  0x7e   : > { %1045 = vmatprep.subr.bf16.mxu0 %v1215_v11  ;;  %1121 = vmatprep.subr.bf16.mxu1 %v1224_v4  ;;  %v1228_v8 = vld [vmem:[%s1704_s3 + $0x38] sm:$0xff]   ;;  %v850_v9 = vld [vmem:[%s1706_s5 + $0x10] sm:$0xff] }
  0x7f   : > { %1204 = vset.pattern.permute.xlu1 %v1363_v10  ;;  %1203 = vset.pattern.permute.xlu0 %v1363_v10  ;;  %v851_v11 = vld [vmem:[%s1706_s5 + $0x18] sm:$0xff] }
  0x80   : > { %864 = vperm.xlu1 %1204, %v850_v9  }
  0x81   : > { %1046 = vmatpush3.bf16.msra.mxu0 %v1216_v15  ;;  %1122 = vmatpush3.bf16.msra.mxu1 %v1224_v4 }
  0x82   : > { %1047 = vmatprep.subr.bf16.mxu0 %v1217_v16  ;;  %1123 = vmatprep.subr.bf16.mxu1 %v1225_v5 }
  0x84   : > { %869 = vperm.xlu1 %1204, %v851_v11  }
  0x85   : > { %1048 = vmatpush3.bf16.msra.mxu0 %v1218_v17  ;;  %1124 = vmatpush3.bf16.msra.mxu1 %v1225_v5 }
  0x86   : > { %1049 = vmatprep.subr.bf16.mxu0 %v1219_v18  ;;  %1125 = vmatprep.subr.bf16.mxu1 %v1226_v6 }
  0x89   : > { %1050 = vmatpush3.bf16.msra.mxu0 %v1220_v19  ;;  %1126 = vmatpush3.bf16.msra.mxu1 %v1226_v6 }
  0x8a   : > { %1127 = vmatprep.subr.bf16.mxu1 %v1227_v7 }
  0x8c   : > { %544 = vmatmul.mubr.bf16.vlgmr.msra.gmra.mrb[0].mxu0 %v360_v27 }
  0x8d   : > { %551 = vmatprep.mubr.bf16.mxu0 %v363_v28  ;;  %1128 = vmatpush3.bf16.msra.mxu1 %v1227_v7 }
  0x8e   : > { %1129 = vmatprep.subr.bf16.mxu1 %v1228_v8 }
  0x91   : > { %1130 = vmatpush3.bf16.msra.mxu1 %v1228_v8 }
  0x94   : > { %552 = vmatmul.mubr.bf16.gmra.mrb[4].mxu0 %v362_v33 }
  0x95   : > { %559 = vmatprep.mubr.bf16.mxu0 %v365_v34 }
  0x9c   : > { %560 = vmatmul.mubr.bf16.gmra.mrb[8].mxu0 %v364_v39 }
  0x9d   : > { %567 = vmatprep.mubr.bf16.mxu0 %v367_v40 }
  0xa4   : > { %568 = vmatmul.mubr.bf16.gmra.mrb[12].mxu0 %v366_v45 }
  0xa5   : > { %575 = vmatprep.mubr.bf16.mxu0 %v369_v46 }
  0xac   : > { %576 = vmatmul.mubr.bf16.gmra.mrb[16].mxu0 %v368_v51 }
  0xad   : > { %583 = vmatprep.mubr.bf16.mxu0 %v371_v52 }
  0xb4   : > { %584 = vmatmul.mubr.bf16.gmra.mrb[20].mxu0 %v370_v57 }
  0xb5   : > { %591 = vmatprep.mubr.bf16.mxu0 %v373_v58 }
  0xbc   : > { %592 = vmatmul.mubr.bf16.gmra.mrb[24].mxu0 %v372_v63 }
  0xbd   : > { %599 = vmatprep.mubr.bf16.mxu0 %v375_v0 }
  0xc4   : > { %600 = vmatmul.mubr.bf16.gmra.mrb[28].mxu0 %v374_v3 }
 0x15f   : > { %v1051_v12 = vpop.f32.mrb[0].mxu0 }
 0x160   : > { %v1052_v13 = vpop.f32.mrb[1].mxu0 }
 0x161   : > { %v1053_v15 = vadd.f32 %v1052_v13, %v1051_v12  ;;  %v1054_v16 = vpop.f32.mrb[2].mxu0 }
 0x162   : > { %v1055_v17 = vpop.f32.mrb[3].mxu0 }
 0x163   : > { %v1056_v18 = vadd.f32 %v1055_v17, %v1054_v16  ;;  %v546_v19 = vadd.f32 %v1053_v15, %v1625_v14 }
 0x165   : > { %v549_v20 = vadd.f32 %v1056_v18, %v1625_v14  ;;  %v608_v22 = vmax.f32 %v546_v19, 0.0 }
 0x167   : > { %v1057_v21 = vpop.f32.mrb[4].mxu0  ;;  %v609_v23 = vmax.f32 %v549_v20, 0.0 }
 0x168   : > { %v1058_v24 = vpop.f32.mrb[5].mxu0 }
 0x169   : > { %v1059_v25 = vadd.f32 %v1058_v24, %v1057_v21  ;;  %v1060_v26 = vpop.f32.mrb[6].mxu0  ;;  %v624_v27 = vpack.c.bf16 %v609_v23, %v608_v22 }
 0x16a   : > { %v1061_v28 = vpop.f32.mrb[7].mxu0 }
 0x16b   : > { %v554_v29 = vadd.f32 %v1059_v25, %v1625_v14  ;;  %v1062_v30 = vadd.f32 %v1061_v28, %v1060_v26  ;;  %1131 = vmatprep.mubr.bf16.mxu1 %v624_v27 }
 0x16d   : > { %v557_v31 = vadd.f32 %v1062_v30, %v1625_v14  ;;  %v610_v32 = vmax.f32 %v554_v29, 0.0 }
 0x16f   : > { %v611_v33 = vmax.f32 %v557_v31, 0.0  ;;  %v1063_v34 = vpop.f32.mrb[8].mxu0 }
 0x170   : > { %v1064_v35 = vpop.f32.mrb[9].mxu0 }
 0x171   : > { %v1065_v36 = vadd.f32 %v1064_v35, %v1063_v34  ;;  %v1066_v37 = vpop.f32.mrb[10].mxu0  ;;  %v625_v38 = vpack.c.bf16 %v611_v33, %v610_v32 }
 0x172   : > { %v1067_v39 = vpop.f32.mrb[11].mxu0 }
 0x173   : > { %v562_v40 = vadd.f32 %v1065_v36, %v1625_v14  ;;  %v1068_v41 = vadd.f32 %v1067_v39, %v1066_v37  ;;  %1132 = vmatmul.mubr.bf16.vlgmr.msra.gmra.mrb[0].mxu1 %v625_v38  ;;  %v848_v38 = vld [vmem:[%s1706_s5] sm:$0xff]  ;;  %v849_v39 = vld [vmem:[%s1706_s5 + $0x8] sm:$0xff] }
 0x174   : > { %854 = vperm.xlu0 %1203, %v848_v38  }
 0x175   : > { %v565_v42 = vadd.f32 %v1068_v41, %v1625_v14  ;;  %v612_v43 = vmax.f32 %v562_v40, 0.0  ;;  %v885_v40 = vld [vmem:[#allocation2] sm:$0x1] }
 0x177   : > { %v613_v44 = vmax.f32 %v565_v42, 0.0  ;;  %v1069_v45 = vpop.f32.mrb[12].mxu0 }
 0x178   : > { %v1070_v46 = vpop.f32.mrb[13].mxu0  ;;  %859 = vperm.xlu0 %1203, %v849_v39  }
 0x179   : > { %v1071_v47 = vadd.f32 %v1070_v46, %v1069_v45  ;;  %v1072_v48 = vpop.f32.mrb[14].mxu0  ;;  %v626_v49 = vpack.c.bf16 %v613_v44, %v612_v43 }
 0x17a   : > { %v1073_v50 = vpop.f32.mrb[15].mxu0 }
 0x17b   : > { %v570_v51 = vadd.f32 %v1071_v47, %v1625_v14  ;;  %v1074_v52 = vadd.f32 %v1073_v50, %v1072_v48  ;;  %1135 = vmatprep.mubr.bf16.mxu1 %v626_v49 }
 0x17c   : > { %888 = vperm.xlu0 %1203, %v885_v40   ;;  %v891_v40 = vlaneseq }
 0x17d   : > { %v573_v53 = vadd.f32 %v1074_v52, %v1625_v14  ;;  %v614_v54 = vmax.f32 %v570_v51, 0.0 }
 0x17f   : > { %v615_v55 = vmax.f32 %v573_v53, 0.0  ;;  %v1075_v56 = vpop.f32.mrb[16].mxu0 }
 0x180   : > { %v1076_v57 = vpop.f32.mrb[17].mxu0 }
 0x181   : > { %v1077_v58 = vadd.f32 %v1076_v57, %v1075_v56  ;;  %v1078_v59 = vpop.f32.mrb[18].mxu0  ;;  %v627_v60 = vpack.c.bf16 %v615_v55, %v614_v54 }
 0x182   : > { %v1079_v61 = vpop.f32.mrb[19].mxu0 }
 0x183   : > { %v578_v62 = vadd.f32 %v1077_v58, %v1625_v14  ;;  %v1080_v63 = vadd.f32 %v1079_v61, %v1078_v59  ;;  %1136 = vmatmul.mubr.bf16.gmra.mrb[4].mxu1 %v627_v60 }
 0x185   : > { %v581_v0 = vadd.f32 %v1080_v63, %v1625_v14  ;;  %v616_v1 = vmax.f32 %v578_v62, 0.0 }
 0x187   : > { %v617_v2 = vmax.f32 %v581_v0, 0.0  ;;  %v1081_v3 = vpop.f32.mrb[20].mxu0 }
 0x188   : > { %v1082_v4 = vpop.f32.mrb[21].mxu0 }
 0x189   : > { %v1083_v5 = vadd.f32 %v1082_v4, %v1081_v3  ;;  %v1084_v6 = vpop.f32.mrb[22].mxu0  ;;  %v628_v7 = vpack.c.bf16 %v617_v2, %v616_v1 }
 0x18a   : > { %v1085_v8 = vpop.f32.mrb[23].mxu0 }
 0x18b   : > { %v586_v9 = vadd.f32 %v1083_v5, %v1625_v14  ;;  %v1086_v10 = vadd.f32 %v1085_v8, %v1084_v6  ;;  %1139 = vmatprep.mubr.bf16.mxu1 %v628_v7 }
 0x18d   : > { %v589_v11 = vadd.f32 %v1086_v10, %v1625_v14  ;;  %v618_v12 = vmax.f32 %v586_v9, 0.0 }
 0x18f   : > { %v619_v13 = vmax.f32 %v589_v11, 0.0  ;;  %v1087_v15 = vpop.f32.mrb[24].mxu0 }
 0x190   : > { %v1088_v16 = vpop.f32.mrb[25].mxu0 }
 0x191   : > { %v1089_v17 = vadd.f32 %v1088_v16, %v1087_v15  ;;  %v1090_v18 = vpop.f32.mrb[26].mxu0  ;;  %v629_v19 = vpack.c.bf16 %v619_v13, %v618_v12 }
 0x192   : > { %v1091_v20 = vpop.f32.mrb[27].mxu0 }
 0x193   : > { %v594_v21 = vadd.f32 %v1089_v17, %v1625_v14  ;;  %v1092_v22 = vadd.f32 %v1091_v20, %v1090_v18  ;;  %1140 = vmatmul.mubr.bf16.gmra.mrb[8].mxu1 %v629_v19 }
 0x195   : > { %v597_v23 = vadd.f32 %v1092_v22, %v1625_v14  ;;  %v620_v24 = vmax.f32 %v594_v21, 0.0 }
 0x197   : > { %v621_v25 = vmax.f32 %v597_v23, 0.0  ;;  %v1093_v26 = vpop.f32.mrb[28].mxu0 }
 0x198   : > { %v1094_v27 = vpop.f32.mrb[29].mxu0 }
 0x199   : > { %v1095_v28 = vadd.f32 %v1094_v27, %v1093_v26  ;;  %v1096_v29 = vpop.f32.mrb[30].mxu0  ;;  %v630_v30 = vpack.c.bf16 %v621_v25, %v620_v24  ;;  %v865_v26 = vpop.permute.xlu1 %864 }
 0x19a   : > { %v1097_v31 = vpop.f32.mrb[31].mxu0 }
 0x19b   : > { %v602_v32 = vadd.f32 %v1095_v28, %v1625_v14  ;;  %v1098_v33 = vadd.f32 %v1097_v31, %v1096_v29  ;;  %1143 = vmatprep.mubr.bf16.mxu1 %v630_v30 }
 0x19d   : > { %v605_v34 = vadd.f32 %v1098_v33, %v1625_v14  ;;  %v622_v35 = vmax.f32 %v602_v32, 0.0  ;;  %v1020_v14 = vld [vmem:[%s1705_s4] ss:$0 sm:$0xff]  ;;  %v870_v27 = vpop.permute.xlu1 %869 }
 0x19f   : > { %v623_v36 = vmax.f32 %v605_v34, 0.0 }
 0x1a1   : > { %v631_v37 = vpack.c.bf16 %v623_v36, %v622_v35 }
 0x1a3   : > { %1144 = vmatmul.mubr.bf16.gmra.mrb[12].mxu1 %v631_v37 }
 0x1f3   : > { %v855_v28 = vpop.permute.xlu0 %854 }
 0x1f7   : > { %v860_v31 = vpop.permute.xlu0 %859 }
 0x246   : > { %v1133_v41 = vpop.f32.mrb[0].mxu1 }
 0x247   : > { %v737_v42 = vpop.f32.mrb[1].mxu1  ;;  %v746_v48 = vadd.f32 %v1133_v41, %v1020_v14 }
 0x248   : > { %v738_v43 = vadd.f32 %v1020_v14, %v737_v42  ;;  %v1134_v44 = vpop.f32.mrb[2].mxu1  ;;  %v892_v42 = vshrl.u32 %v891_v40, 7 }
 0x249   : > { %v740_v45 = vpop.f32.mrb[3].mxu1  ;;  %v802_v50 = vmax.f32 %v746_v48, 0.0  ;;  %v749_v51 = vadd.f32 %v1134_v44, %v1020_v14 }
 0x24a   : > { %v800_v46 = vmax.f32 %v738_v43, 0.0  ;;  %v741_v47 = vadd.f32 %v1020_v14, %v740_v45  ;;  %v893_v45 = vsub.s32 0, %v892_v42 }
 0x24b   : > { %v803_v52 = vmax.f32 %v749_v51, 0.0 }
 0x24c   : > { %816 = vxpose.xlu1.b32.start [1/16] (narrow) %v800_v46, 32  ;;  %v801_v49 = vmax.f32 %v741_v47, 0.0  ;;  %v889_v47 = vpop.permute.xlu0 %888 }
 0x250   : > { %817 = vxpose.xlu1.b32.cont [2/16] (narrow) %v801_v49, 32  ;;  %v894_v49 = vrot.slane %v889_v47, %v893_v45 }
 0x254   : > { %818 = vxpose.xlu1.b32.cont [3/16] (narrow) %v802_v50, 32 }
 0x256   : > { %v1137_v53 = vpop.f32.mrb[4].mxu1 }
 0x257   : > { %v753_v54 = vpop.f32.mrb[5].mxu1  ;;  %v762_v60 = vadd.f32 %v1137_v53, %v1020_v14 }
 0x258   : > { %v754_v55 = vadd.f32 %v1020_v14, %v753_v54  ;;  %v1138_v56 = vpop.f32.mrb[6].mxu1  ;;  %819 = vxpose.xlu1.b32.cont [4/16] (narrow) %v803_v52, 32 }
 0x259   : > { %v756_v57 = vpop.f32.mrb[7].mxu1  ;;  %v806_v62 = vmax.f32 %v762_v60, 0.0  ;;  %v765_v63 = vadd.f32 %v1138_v56, %v1020_v14 }
 0x25a   : > { %v804_v58 = vmax.f32 %v754_v55, 0.0  ;;  %v757_v59 = vadd.f32 %v1020_v14, %v756_v57 }
 0x25b   : > { %v807_v0 = vmax.f32 %v765_v63, 0.0 }
 0x25c   : > { %820 = vxpose.xlu1.b32.cont [5/16] (narrow) %v804_v58, 32  ;;  %v805_v61 = vmax.f32 %v757_v59, 0.0 }
 0x260   : > { %821 = vxpose.xlu1.b32.cont [6/16] (narrow) %v805_v61, 32 }
 0x264   : > { %822 = vxpose.xlu1.b32.cont [7/16] (narrow) %v806_v62, 32 }
 0x266   : > { %v1141_v1 = vpop.f32.mrb[8].mxu1 }
 0x267   : > { %v769_v2 = vpop.f32.mrb[9].mxu1  ;;  %v778_v8 = vadd.f32 %v1141_v1, %v1020_v14 }
 0x268   : > { %v770_v3 = vadd.f32 %v1020_v14, %v769_v2  ;;  %v1142_v4 = vpop.f32.mrb[10].mxu1  ;;  %823 = vxpose.xlu1.b32.cont [8/16] (narrow) %v807_v0, 32 }
 0x269   : > { %v772_v5 = vpop.f32.mrb[11].mxu1  ;;  %v810_v10 = vmax.f32 %v778_v8, 0.0  ;;  %v781_v11 = vadd.f32 %v1142_v4, %v1020_v14 }
 0x26a   : > { %v808_v6 = vmax.f32 %v770_v3, 0.0  ;;  %v773_v7 = vadd.f32 %v1020_v14, %v772_v5 }
 0x26b   : > { %v811_v12 = vmax.f32 %v781_v11, 0.0 }
 0x26c   : > { %824 = vxpose.xlu1.b32.cont [9/16] (narrow) %v808_v6, 32  ;;  %v809_v9 = vmax.f32 %v773_v7, 0.0 }
 0x270   : > { %825 = vxpose.xlu1.b32.cont [10/16] (narrow) %v809_v9, 32 }
 0x274   : > { %826 = vxpose.xlu1.b32.cont [11/16] (narrow) %v810_v10, 32 }
 0x276   : > { %v1145_v13 = vpop.f32.mrb[12].mxu1 }
 0x277   : > { %v785_v15 = vpop.f32.mrb[13].mxu1  ;;  %v794_v21 = vadd.f32 %v1145_v13, %v1020_v14 }
 0x278   : > { %v786_v16 = vadd.f32 %v1020_v14, %v785_v15  ;;  %v1146_v17 = vpop.f32.mrb[14].mxu1  ;;  %827 = vxpose.xlu1.b32.cont [12/16] (narrow) %v811_v12, 32 }
 0x279   : > { %v788_v18 = vpop.f32.mrb[15].mxu1  ;;  %v814_v23 = vmax.f32 %v794_v21, 0.0  ;;  %v797_v24 = vadd.f32 %v1146_v17, %v1020_v14 }
 0x27a   : > { %v812_v19 = vmax.f32 %v786_v16, 0.0  ;;  %v789_v20 = vadd.f32 %v1020_v14, %v788_v18 }
 0x27b   : > { %v815_v25 = vmax.f32 %v797_v24, 0.0 }
 0x27c   : > { %828 = vxpose.xlu1.b32.cont [13/16] (narrow) %v812_v19, 32  ;;  %v813_v22 = vmax.f32 %v789_v20, 0.0 }
 0x280   : > { %829 = vxpose.xlu1.b32.cont [14/16] (narrow) %v813_v22, 32 }
 0x284   : > { %830 = vxpose.xlu1.b32.cont [15/16] (narrow) %v814_v23, 32 }
 0x288   : > { %831 = vxpose.xlu1.b32.end [16/16] (narrow) %v815_v25, 32 }
 0x2cc   : > { %v832_v29 = vpop.trf.xlu1 }
 0x2cd   : > { %v872_v34 = vmul.f32 %v855_v28, %v832_v29 }
 0x2d0   : > { %v833_v30 = vpop.trf.xlu1 }
 0x2d1   : > { %v873_v32 = vmul.f32 %v860_v31, %v833_v30 }
 0x2d3   : > { %v876_v36 = vadd.f32 %v873_v32, %v872_v34 }
 0x2d4   : > { %v834_v33 = vpop.trf.xlu1 }
 0x2d5   : > { %v874_v35 = vmul.f32 %v865_v26, %v834_v33 }
 0x2d7   : > { %v877_v38 = vadd.f32 %v876_v36, %v874_v35 }
 0x2d8   : > { %v835_v37 = vpop.trf.xlu1 }
 0x2d9   : > { %v875_v39 = vmul.f32 %v870_v27, %v835_v37 }
 0x2db   : > { %v878_v14 = vadd.f32 %v877_v38, %v875_v39 }
 0x2dd   : > { %v879_v41 = vrot.slane %v878_v14, 4 }
 0x2df   : > { %v880_v43 = vadd.f32 %v879_v41, %v878_v14 }
 0x2e1   : > { %v881_v44 = vrot.slane %v880_v43, 2 }
 0x2e3   : > { %v882_v46 = vadd.f32 %v881_v44, %v880_v43 }
 0x2e5   : > { %v883_v48 = vrot.slane %v882_v46, 1 }
 0x2e7   : > { %v884_v50 = vadd.f32 %v883_v48, %v882_v46 }
 0x2e9   : > { %v895_v51 = vadd.f32 %v894_v49, %v884_v50 }
 0x2eb   : > { %v896_v52 = vmax.f32 %v895_v51, 0.0 }
 0x2ed   : > { %897 = vst [vmem:[%s320_s16] sm:$0x1] %v896_v52 }
 0x2ee   : > { %1298 = shalt.err (!%p1295_p2)
}
 0x2ef   : > { %s1299_s25 = scalar_lea.hbm %s1657_s21, 16  ;;  %s1303_s10 = scalar_lea.hbm %s1708_s7, 32 }
 0x2f0   : > { %p1300_p3 = scmp.ne.s32.totalorder %s1657_s21, %s1299_s25  ;;  %p1304_p6 = scmp.lt.u32.totalorder %s1657_s21, %s1708_s7 }
 0x2f1   : > { %p1305_p8 = scmp.lt.u32.totalorder %s1303_s10, %s1299_s25  ;;  %p1307_p1 = scmp.lt.u32.totalorder %s1299_s25, %s1657_s21 }
 0x2f2   : > { %p1301_p13 = pnand %p1300_p3, %p1724_p10 }
 0x2f3   : > { %p1306_p9 = por %p1305_p8, %p1304_p6 }
 0x2f4   : > { %p1302_p7 = pneg %p1301_p13 }
 0x2f5   : > { %p1308_p4 = por %p1307_p1, %p1306_p9 }
 0x2f7   : > { %p1309_p5 = pnand %p1308_p4, %p1302_p7 }
 0x2f9   : > { %1312 = shalt.err (!%p1309_p5)
}
 0x2fa   : > { %1152 = dma.vmem_to_hbm [thread:$0]  (%p1724_p10), %s1659_s19, 16, %s1657_s21, %s899_s12  }
 0x2fb PF: > { %s923_s16 = sand.u32 1, %s1343_s26   ;;  %p1725_p11 = scmp.ne.s32.totalorder %s1716_s15, 0 }
 0x2fc   : > { %s924_s30 = scalar_lea.sflag [#allocation5], %s923_s16 }
 0x2fd   : > { %p1159_p12 = pnand %p990_p0, %p1725_p11 }
 0x2ff   : > { %1338 = dma.done.wait (!%p1159_p12), %s924_s30, 16  }
 0x300   : > { %1340 = vsyncadd (!%p1159_p12), %s924_s30, 4294967280  ;;  %p23_p2 = scmp.ge.s32.totalorder %s1433_s8, 4   ;;  %s1726_s26 = smov %s1347_s27 }
 0x301   : > { %s1727_s27 = smov %s1351_s28  ;;  %s1728_s28 = smov %s1445_s11 }
 0x302   : > { %s1729_s29 = smov %s1433_s8  ;;  %25 = sbr.rel (!%p23_p2) target bundleno = 9 (0x9), region = 97 }
 0x309   :  { %928 = vsyncpa [#allocation4], 1 }
 0x30a   :  { %930 = vsyncpa [#allocation4 + $0x1], 1 }
 0x30b   :  { %931 = vsyncpa [#allocation7], 1 }
 0x30c   :  { %932 = vsyncpa [#allocation5], 1 }
 0x30d   :  { %934 = vsyncpa [#allocation5 + $0x1], 1 }

</bundles_post_ra>
